<compile_context>
chip_gen: v5e
topology: v5e:2x2
jax: 0.10.0
libtpu: 0.0.40
codegen_flags: <defaults>
</compile_context>

<pallas_src>
import functools

import jax
import jax.numpy as jnp
from jax.experimental import pallas as pl
from jax.experimental.pallas import tpu as pltpu


def _round_up(x: int, m: int) -> int:
    return ((x + m - 1) // m) * m


def _ln2d_kernel_vpu(x_ref, wb_ref, o_ref, *, eps):
    # Small-C path: channel reduction on the VPU/XLU.
    # x_ref: (Nb, C, T)   wb_ref: (2, C, 1)   o_ref: (Nb, C, T)
    x = x_ref[...].astype(jnp.float32)
    wb = wb_ref[...].astype(jnp.float32)            # (2, C, 1)
    w = wb[0][None]                                 # (1, C, 1)
    b = wb[1][None]                                 # (1, C, 1)

    u = jnp.mean(x, axis=1, keepdims=True)          # (Nb, 1, T)
    d = x - u
    s = jnp.mean(d * d, axis=1, keepdims=True)      # biased variance (Nb, 1, T)
    inv = jax.lax.rsqrt(s + eps)                    # EUP on the small stats tensor
    o_ref[...] = (w * (d * inv) + b).astype(o_ref.dtype)


def _ln2d_kernel_mxu(x_ref, wb_ref, o_ref, *, eps, inv_c):
    # Large-C path: channel reductions on the MXU via ones-vector matmuls.
    # x_ref: (Nb, C, T)   wb_ref: (2, C, 1)   o_ref: (Nb, C, T)
    nb, c, _ = x_ref.shape
    wb = wb_ref[...].astype(jnp.float32)            # (2, C, 1)

    if nb == 1:
        x = x_ref[0].astype(jnp.float32)            # (C, T)
        w = wb[0]                                   # (C, 1)
        b = wb[1]                                   # (C, 1)
        ones_row = jnp.ones((1, c), jnp.float32)
        u = jnp.dot(ones_row, x, preferred_element_type=jnp.float32) * inv_c       # (1, T)
        d = x - u                                                                   # (C, T)
        s = jnp.dot(ones_row, d * d, preferred_element_type=jnp.float32) * inv_c    # (1, T)
        inv = jax.lax.rsqrt(s + eps)
        o_ref[...] = ((w * (d * inv) + b)[None]).astype(o_ref.dtype)
    else:
        x = x_ref[...].astype(jnp.float32)          # (Nb, C, T)
        w = wb[0][None]                             # (1, C, 1)
        b = wb[1][None]                             # (1, C, 1)
        ones = jnp.ones((nb, 1, c), jnp.float32)
        u = jnp.einsum("boc,bct->bot", ones, x,
                       preferred_element_type=jnp.float32) * inv_c                  # (Nb,1,T)
        d = x - u
        s = jnp.einsum("boc,bct->bot", ones, d * d,
                       preferred_element_type=jnp.float32) * inv_c                  # (Nb,1,T)
        inv = jax.lax.rsqrt(s + eps)
        o_ref[...] = (w * (d * inv) + b).astype(o_ref.dtype)


def layernorm2d(x, weight, bias, eps: float = 1e-6):
    """x: (N, C, H, W) NCHW. weight, bias: (C,). Returns (N, C, H, W)."""
    N, C, H, W = x.shape
    HW = H * W
    dtype = x.dtype

    # --- Tile selection -----------------------------------------------------
    # ~2 MiB per f32 block -> <=16 MiB for double-buffered in+out, safe under
    # the 32 MiB scoped VMEM limit on all generations including v7x.
    block_budget = 2 * 1024 * 1024
    hw128 = _round_up(HW, 128)
    t_max = max(128, min(4096, ((block_budget // (4 * C)) // 128) * 128))
    nt = -(-hw128 // t_max)                         # number of spatial tiles
    T = _round_up(-(-hw128 // nt), 128)             # evenly split, 128-aligned (min padding)
    HW_pad = nt * T

    # Fold batch elements into one block when the per-image block is small, to
    # amortize per-grid-step overhead.
    Nb = 1
    for cand in range(N, 0, -1):
        if N % cand == 0 and cand * C * T * 4 <= block_budget:
            Nb = cand
            break

    use_mxu = C >= 128

    # --- Input prep ---------------------------------------------------------
    x3 = x.reshape(N, C, HW)
    if HW_pad != HW:
        # Pad the spatial axis; the reduction is over channels only, so padded
        # lanes just produce values that are sliced off afterwards.
        x3 = jnp.pad(x3, ((0, 0), (0, 0), (0, HW_pad - HW)))

    wb = jnp.stack([weight, bias]).reshape(2, C, 1)  # packed affine params

    if use_mxu:
        kernel = functools.partial(_ln2d_kernel_mxu, eps=eps, inv_c=1.0 / C)
    else:
        kernel = functools.partial(_ln2d_kernel_vpu, eps=eps)

    grid = (N // Nb, HW_pad // T)

    out = pl.pallas_call(
        kernel,
        out_shape=jax.ShapeDtypeStruct((N, C, HW_pad), dtype),
        grid_spec=pltpu.PrefetchScalarGridSpec(
            num_scalar_prefetch=0,
            grid=grid,
            in_specs=[
                pl.BlockSpec((Nb, C, T), lambda n, t: (n, 0, t)),
                pl.BlockSpec((2, C, 1), lambda n, t: (0, 0, 0)),
            ],
            out_specs=pl.BlockSpec((Nb, C, T), lambda n, t: (n, 0, t)),
        ),
        compiler_params=pltpu.CompilerParams(
            dimension_semantics=("parallel", "parallel"),
            vmem_limit_bytes=32 * 1024 * 1024,
        ),
    )(x3, wb)

    if HW_pad != HW:
        out = out[:, :, :HW]
    return out.reshape(N, C, H, W)


def _reference(x, weight, bias, eps=1e-6):
    u = jnp.mean(x, axis=1, keepdims=True)
    s = jnp.mean((x - u) ** 2, axis=1, keepdims=True)
    xn = (x - u) / jnp.sqrt(s + eps)
    return weight[None, :, None, None] * xn + bias[None, :, None, None]


if __name__ == "__main__":
    key = jax.random.PRNGKey(0)
    N, C, H, W = 2, 4, 16, 16
    kx, kw, kb = jax.random.split(key, 3)
    x = jax.random.normal(kx, (N, C, H, W), dtype=jnp.float32)

    # Parameter init matching the nn.Module (ones / zeros), perturbed
    # deterministically so the affine part is actually exercised.
    weight = jnp.ones((C,), dtype=jnp.float32) + 0.1 * jax.random.normal(kw, (C,))
    bias = jnp.zeros((C,), dtype=jnp.float32) + 0.1 * jax.random.normal(kb, (C,))

    y = layernorm2d(x, weight, bias)
    y = jax.block_until_ready(y)

    y_ref = _reference(x, weight, bias)
    assert y.shape == (N, C, H, W)
    assert jnp.allclose(y, y_ref, atol=1e-5, rtol=1e-5)

    print("KERNEL_OK")
</pallas_src>

<mosaic_0001>
module attributes {stable_mosaic.version = 11 : i64} {
  func.func @_ln2d_kernel_vpu(%arg0: i32, %arg1: i32, %arg2: memref<2x4x256xf32, #tpu.memory_space<vmem>>, %arg3: memref<2x4x1xf32, #tpu.memory_space<vmem>>, %arg4: memref<2x4x256xf32, #tpu.memory_space<vmem>>) attributes {dimension_semantics = [#tpu.dimension_semantics<parallel>, #tpu.dimension_semantics<parallel>], iteration_bounds = array<i64: 1, 1>, scalar_prefetch = 0 : i64, scratch_operands = 0 : i64, tpu.core_type = #tpu.core_type<tc>, window_params = [{transform_indices = @transform_0, window_bounds = array<i64: 2, 4, 256>}, {pipeline_mode = #tpu.pipeline_mode<synchronous>, transform_indices = @transform_1, window_bounds = array<i64: 2, 4, 1>}, {transform_indices = @transform_2, window_bounds = array<i64: 2, 4, 256>}]} {
    %c0 = arith.constant 0 : index
    %c0_0 = arith.constant 0 : index
    %c0_1 = arith.constant 0 : index
    %0 = vector.load %arg2[%c0, %c0_0, %c0_1] : memref<2x4x256xf32, #tpu.memory_space<vmem>>, vector<2x4x256xf32>
    %c0_2 = arith.constant 0 : index
    %c0_3 = arith.constant 0 : index
    %c0_4 = arith.constant 0 : index
    %1 = vector.load %arg3[%c0_2, %c0_3, %c0_4] : memref<2x4x1xf32, #tpu.memory_space<vmem>>, vector<2x4x1xf32>
    %2 = vector.extract_strided_slice %1 {offsets = [0, 0, 0], sizes = [1, 4, 1], strides = [1, 1, 1]} : vector<2x4x1xf32> to vector<1x4x1xf32>
    %3 = vector.shape_cast %2 : vector<1x4x1xf32> to vector<4x1xf32>
    %4 = vector.shape_cast %3 : vector<4x1xf32> to vector<1x4x1xf32>
    %5 = vector.extract_strided_slice %1 {offsets = [1, 0, 0], sizes = [1, 4, 1], strides = [1, 1, 1]} : vector<2x4x1xf32> to vector<1x4x1xf32>
    %6 = vector.shape_cast %5 : vector<1x4x1xf32> to vector<4x1xf32>
    %7 = vector.shape_cast %6 : vector<4x1xf32> to vector<1x4x1xf32>
    %cst = arith.constant dense<0.000000e+00> : vector<2x256xf32>
    %8 = vector.multi_reduction <add>, %0, %cst [1] : vector<2x4x256xf32> to vector<2x256xf32>
    %9 = vector.shape_cast %8 : vector<2x256xf32> to vector<2x1x256xf32>
    %cst_5 = arith.constant 4.000000e+00 : f32
    %10 = vector.broadcast %cst_5 : f32 to vector<2x1x256xf32>
    %11 = arith.divf %9, %10 : vector<2x1x256xf32>
    %12 = vector.broadcast %11 : vector<2x1x256xf32> to vector<2x4x256xf32>
    %13 = arith.subf %0, %12 : vector<2x4x256xf32>
    %14 = arith.mulf %13, %13 : vector<2x4x256xf32>
    %cst_6 = arith.constant dense<0.000000e+00> : vector<2x256xf32>
    %15 = vector.multi_reduction <add>, %14, %cst_6 [1] : vector<2x4x256xf32> to vector<2x256xf32>
    %16 = vector.shape_cast %15 : vector<2x256xf32> to vector<2x1x256xf32>
    %cst_7 = arith.constant 4.000000e+00 : f32
    %17 = vector.broadcast %cst_7 : f32 to vector<2x1x256xf32>
    %18 = arith.divf %16, %17 : vector<2x1x256xf32>
    %cst_8 = arith.constant 9.99999997E-7 : f32
    %19 = vector.broadcast %cst_8 : f32 to vector<2x1x256xf32>
    %20 = arith.addf %18, %19 : vector<2x1x256xf32>
    %21 = math.rsqrt %20 : vector<2x1x256xf32>
    %22 = vector.broadcast %21 : vector<2x1x256xf32> to vector<2x4x256xf32>
    %23 = arith.mulf %13, %22 : vector<2x4x256xf32>
    %24 = vector.broadcast %4 : vector<1x4x1xf32> to vector<2x4x256xf32>
    %25 = arith.mulf %24, %23 : vector<2x4x256xf32>
    %26 = vector.broadcast %7 : vector<1x4x1xf32> to vector<2x4x256xf32>
    %27 = arith.addf %25, %26 : vector<2x4x256xf32>
    %c0_9 = arith.constant 0 : index
    %c0_10 = arith.constant 0 : index
    %c0_11 = arith.constant 0 : index
    %28 = vector.load %arg4[%c0_9, %c0_10, %c0_11] : memref<2x4x256xf32, #tpu.memory_space<vmem>>, vector<2x4x256xf32>
    tpu.vector_store %arg4[%c0_9, %c0_10, %c0_11], %27 {strides = array<i32>} : memref<2x4x256xf32, #tpu.memory_space<vmem>>, vector<2x4x256xf32>,
    return
  }
  func.func @transform_0(%arg0: i32, %arg1: i32) -> (i32, i32, i32) {
    %c0_i32 = arith.constant 0 : i32
    %c0_i32_0 = arith.constant 0 : i32
    return %arg0, %c0_i32, %arg1 : i32, i32, i32
  }
  func.func @transform_1(%arg0: i32, %arg1: i32) -> (i32, i32, i32) {
    %c0_i32 = arith.constant 0 : i32
    %c0_i32_0 = arith.constant 0 : i32
    %c0_i32_1 = arith.constant 0 : i32
    %c0_i32_2 = arith.constant 0 : i32
    return %c0_i32, %c0_i32_0, %c0_i32_1 : i32, i32, i32
  }
  func.func @transform_2(%arg0: i32, %arg1: i32) -> (i32, i32, i32) {
    %c0_i32 = arith.constant 0 : i32
    %c0_i32_0 = arith.constant 0 : i32
    return %arg0, %c0_i32, %arg1 : i32, i32, i32
  }
}

</mosaic_0001>

<bundles_post_ra>
// kernel: tpu_custom_call.1
= control target key start
LH: loop header
LB: loop body
LE: loop exit
PB: predicated region body
PF: predicated region fallthrough
CT: control target
= control target key end

     0   :  { %7 = vsyncpa [#allocation3], 0  ;;  %s406_s0 = inlined_call_operand.hbm [shape: f32[2,4,256], index: 0, kind: input, shape index: {}]   ;;  %s407_s1 = inlined_call_operand.vmem [shape: f32[2,4,1], index: 1, kind: input, shape index: {}]   ;;  %s408_s2 = inlined_call_operand.hbm [shape: f32[2,4,256], index: 2, kind: output, shape index: {}]  }
   0x1   :  { %8 = vsyncpa [#allocation4], 0  ;;  %s13_s11 = sshll.u32 %s406_s0, 4  ;;  %s331_s12 = smov [#allocation2]   ;;  %s14_s11 = int_to_ptr.hbm [resolvable:$true] %s13_s11 }
   0x2   :  { %s15_s13 = sshll.u32 %s331_s12, 4  ;;  %s332_s14 = smov 128   ;;  %s16_s13 = int_to_ptr.vmem [resolvable:$true] %s15_s13 }
   0x3   :  { %s333_s15 = smov 8  }
   0x4   :  { %21 = dma.hbm_to_vmem [thread:$0]  %s14_s11, 256, %s16_s13, [#allocation3], %s332_s14, %s332_s14, %s333_s15  }
   0x5   :  { %327 = dma.done.wait [#allocation3], 256  }
   0x6   :  { %328 = vsyncadd [#allocation3], 4294967040  ;;  %v334_v0 = vmov 0   ;;  %v30_v1 = vld [vmem:[%s407_s1] sm:$0xf]  ;;  %v28_v2 = vld [vmem:[#allocation2] sm:$0xff] }
   0x7   :  { %268 = vset.pattern.permute.xlu0 %v334_v0  ;;  %v29_v3 = vld [vmem:[#allocation2 + $0x8] sm:$0xff]  ;;  %34 = vst [vmem:[#allocation1] ss:$2 sm:$0xff] %v28_v2  ;;  %v335_v4 = vmov 4.0   ;;  %v31_v5 = vld [vmem:[%s407_s1 + $0x4] sm:$0xf] }
   0x8   :  { %202 = vperm.xlu0 %268, %v30_v1   ;;  %38 = vst [vmem:[#allocation1 + $0x10] ss:$2 sm:$0xff] %v29_v3  ;;  %269 = vrcp.f32 %v335_v4  ;;  %vm45_vm0 = vcmask 1043456   ;;  %s336_s1 = smov [#allocation5]   ;;  %s249_s22 = sshll.u32 %s408_s2, 4  ;;  %s250_s22 = int_to_ptr.hbm [resolvable:$true] %s249_s22 }
   0x9   :  { %s247_s19 = sshll.u32 %s336_s1, 4  ;;  %s248_s19 = int_to_ptr.vmem [resolvable:$true] %s247_s19 }
   0xe   :  { %v35_v6 = vld.sshfl [vmem:[#allocation1] sm:$0xff pattern:$0x75316420]  ;;  %v36_v7 = vld.sshfl [vmem:[#allocation1 + $0x8] sm:$0xff pattern:$0x75316420]  ;;  %v270_v8 = vpop.eup %269 }
   0xf   :  { %v39_v9 = vld.sshfl [vmem:[#allocation1 + $0x10] sm:$0xff pattern:$0x75316420]  ;;  %v40_v10 = vld.sshfl [vmem:[#allocation1 + $0x18] sm:$0xff pattern:$0x75316420]  ;;  %vm79_vm1 = vweird.f32 %v270_v8 }
  0x10   :  { %224 = vperm.xlu0 %268, %v31_v5   ;;  %v75_v11 = vmul.f32 4.0, %v270_v8  ;;  %v46_v12 = vsel %vm45_vm0, %v35_v6, 0.0  ;;  %v53_v13 = vsel %vm45_vm0, %v36_v7, 0.0  ;;  %v60_v14 = vsel %vm45_vm0, %v39_v9, 0.0 }
  0x11   :  { %v47_v15 = vrot.slane %v46_v12, 4  ;;  %v54_v16 = vrot.slane %v53_v13, 4  ;;  %v61_v17 = vrot.slane %v60_v14, 4  ;;  %v67_v18 = vsel %vm45_vm0, %v40_v10, 0.0 }
  0x12   :  { %v76_v19 = vsub.f32 1.0, %v75_v11  ;;  %v68_v20 = vrot.slane %v67_v18, 4 }
  0x13   :  { %v48_v21 = vadd.f32 %v47_v15, %v46_v12  ;;  %v55_v22 = vadd.f32 %v54_v16, %v53_v13  ;;  %v62_v23 = vadd.f32 %v61_v17, %v60_v14 }
  0x14   :  { %v77_v24 = vmul.f32 %v270_v8, %v76_v19  ;;  %v69_v25 = vadd.f32 %v68_v20, %v67_v18 }
  0x15   :  { %v49_v26 = vrot.slane %v48_v21, 2  ;;  %v56_v27 = vrot.slane %v55_v22, 2  ;;  %v63_v28 = vrot.slane %v62_v23, 2 }
  0x16   :  { %v78_v29 = vadd.f32 %v270_v8, %v77_v24  ;;  %v70_v30 = vrot.slane %v69_v25, 2 }
  0x17   :  { %v50_v31 = vadd.f32 %v49_v26, %v48_v21  ;;  %v57_v32 = vadd.f32 %v56_v27, %v55_v22  ;;  %v64_v33 = vadd.f32 %v63_v28, %v62_v23 }
  0x18   :  { %v71_v34 = vadd.f32 %v70_v30, %v69_v25  ;;  %v80_v38 = vsel %vm79_vm1, %v270_v8, %v78_v29 }
  0x19   :  { %v51_v35 = vrot.slane %v50_v31, 1  ;;  %v58_v36 = vrot.slane %v57_v32, 1  ;;  %v65_v37 = vrot.slane %v64_v33, 1 }
  0x1a   :  { %v72_v39 = vrot.slane %v71_v34, 1 }
  0x1b   :  { %v52_v40 = vadd.f32 %v51_v35, %v50_v31  ;;  %v59_v41 = vadd.f32 %v58_v36, %v57_v32  ;;  %v66_v42 = vadd.f32 %v65_v37, %v64_v33 }
  0x1c   :  { %v73_v43 = vadd.f32 %v72_v39, %v71_v34 }
  0x1d   :  { %v81_v44 = vmul.f32 %v80_v38, %v52_v40  ;;  %v82_v45 = vmul.f32 %v80_v38, %v59_v41  ;;  %v83_v46 = vmul.f32 %v80_v38, %v66_v42 }
  0x1e   :  { %v84_v47 = vmul.f32 %v80_v38, %v73_v43 }
  0x1f   :  { %v89_v48 = vrot.slane %v82_v45, 4 }
  0x20   :  { %v90_v49 = vrot.slane %v84_v47, 4 }
  0x21   :  { %v91_v50 = vsel %vm45_vm0, %v81_v44, %v89_v48 }
  0x22   :  { %v92_v51 = vsel %vm45_vm0, %v83_v46, %v90_v49  ;;  %v370_v52 = vsub.f32 %v28_v2, %v91_v50 }
  0x23   :  { %v372_v53 = vsub.f32 %v29_v3, %v92_v51 }
  0x24   :  { %v97_v54 = vmul.f32 %v370_v52, %v370_v52 }
  0x25   :  { %v98_v55 = vmul.f32 %v372_v53, %v372_v53 }
  0x26   :  { %101 = vst [vmem:[#allocation1] ss:$2 sm:$0xff] %v97_v54 }
  0x27   :  { %105 = vst [vmem:[#allocation1 + $0x10] ss:$2 sm:$0xff] %v98_v55 }
  0x2d   :  { %v102_v56 = vld.sshfl [vmem:[#allocation1] sm:$0xff pattern:$0x75316420]  ;;  %v103_v57 = vld.sshfl [vmem:[#allocation1 + $0x8] sm:$0xff pattern:$0x75316420] }
  0x2e   :  { %v106_v58 = vld.sshfl [vmem:[#allocation1 + $0x10] sm:$0xff pattern:$0x75316420]  ;;  %v107_v59 = vld.sshfl [vmem:[#allocation1 + $0x18] sm:$0xff pattern:$0x75316420] }
  0x2f   :  { %v112_v60 = vsel %vm45_vm0, %v102_v56, 0.0  ;;  %v119_v61 = vsel %vm45_vm0, %v103_v57, 0.0  ;;  %v126_v62 = vsel %vm45_vm0, %v106_v58, 0.0  ;;  %v133_v63 = vsel %vm45_vm0, %v107_v59, 0.0 }
  0x30   :  { %v113_v0 = vrot.slane %v112_v60, 4  ;;  %v120_v1 = vrot.slane %v119_v61, 4  ;;  %v127_v2 = vrot.slane %v126_v62, 4  ;;  %v134_v3 = vrot.slane %v133_v63, 4 }
  0x32   :  { %v114_v4 = vadd.f32 %v113_v0, %v112_v60  ;;  %v121_v5 = vadd.f32 %v120_v1, %v119_v61  ;;  %v128_v6 = vadd.f32 %v127_v2, %v126_v62  ;;  %v135_v7 = vadd.f32 %v134_v3, %v133_v63 }
  0x34   :  { %v115_v8 = vrot.slane %v114_v4, 2  ;;  %v122_v9 = vrot.slane %v121_v5, 2  ;;  %v129_v10 = vrot.slane %v128_v6, 2  ;;  %v136_v11 = vrot.slane %v135_v7, 2 }
  0x36   :  { %v116_v12 = vadd.f32 %v115_v8, %v114_v4  ;;  %v123_v13 = vadd.f32 %v122_v9, %v121_v5  ;;  %v130_v14 = vadd.f32 %v129_v10, %v128_v6  ;;  %v137_v15 = vadd.f32 %v136_v11, %v135_v7 }
  0x38   :  { %v117_v16 = vrot.slane %v116_v12, 1  ;;  %v124_v17 = vrot.slane %v123_v13, 1  ;;  %v131_v18 = vrot.slane %v130_v14, 1  ;;  %v138_v19 = vrot.slane %v137_v15, 1 }
  0x3a   :  { %v118_v20 = vadd.f32 %v117_v16, %v116_v12  ;;  %v125_v21 = vadd.f32 %v124_v17, %v123_v13  ;;  %v132_v22 = vadd.f32 %v131_v18, %v130_v14  ;;  %v139_v23 = vadd.f32 %v138_v19, %v137_v15 }
  0x3c   :  { %v140_v24 = vmul.f32 %v118_v20, %v80_v38  ;;  %v141_v25 = vmul.f32 %v125_v21, %v80_v38  ;;  %v142_v26 = vmul.f32 %v132_v22, %v80_v38  ;;  %v143_v27 = vmul.f32 %v139_v23, %v80_v38 }
  0x3e   :  { %v144_v28 = vadd.f32 1e-06, %v140_v24  ;;  %v145_v29 = vadd.f32 1e-06, %v141_v25  ;;  %v146_v30 = vadd.f32 1e-06, %v142_v26 }
  0x3f   :  { %v147_v31 = vadd.f32 1e-06, %v143_v27 }
  0x40   :  { %271 = vrsqrt.f32 %v144_v28  ;;  %vm164_vm2 = vweird.f32 %v145_v29  ;;  %vm154_vm4 = vweird.f32 %v144_v28  ;;  %vm174_vm7 = vweird.f32 %v146_v30 }
  0x41   :  { %273 = vrsqrt.f32 %v145_v29  ;;  %vm184_vm8 = vweird.f32 %v147_v31 }
  0x42   :  { %275 = vrsqrt.f32 %v146_v30 }
  0x43   :  { %277 = vrsqrt.f32 %v147_v31 }
  0x46   :  { %v272_v32 = vpop.eup %271 }
  0x47   :  { %v274_v33 = vpop.eup %273  ;;  %v149_v34 = vmul.f32 %v272_v32, %v144_v28  ;;  %vm155_vm5 = vweird.f32 %v272_v32 }
  0x48   :  { %v276_v35 = vpop.eup %275  ;;  %v159_v36 = vmul.f32 %v274_v33, %v145_v29  ;;  %vm165_vm3 = vweird.f32 %v274_v33  ;;  %vm386_vm10 = vmor %vm154_vm4, %vm155_vm5 }
  0x49   :  { %v278_v37 = vpop.eup %277  ;;  %v150_v39 = vmul.f32 %v272_v32, %v149_v34  ;;  %v169_v40 = vmul.f32 %v276_v35, %v146_v30  ;;  %vm382_vm6 = vmor %vm164_vm2, %vm165_vm3  ;;  %vm175_vm11 = vweird.f32 %v276_v35 }
  0x4a   :  { %v160_v41 = vmul.f32 %v274_v33, %v159_v36  ;;  %v179_v42 = vmul.f32 %v278_v37, %v147_v31  ;;  %vm185_vm9 = vweird.f32 %v278_v37  ;;  %vm176_vm13 = vmor %vm174_vm7, %vm175_vm11 }
  0x4b   :  { %v151_v43 = vmul.f32 0.5, %v150_v39  ;;  %v170_v38 = vmul.f32 %v276_v35, %v169_v40  ;;  %vm186_vm12 = vmor %vm184_vm8, %vm185_vm9 }
  0x4c   :  { %v161_v44 = vmul.f32 0.5, %v160_v41  ;;  %v180_v47 = vmul.f32 %v278_v37, %v179_v42 }
  0x4d   :  { %v152_v45 = vsub.f32 1.5, %v151_v43  ;;  %v171_v46 = vmul.f32 0.5, %v170_v38 }
  0x4e   :  { %v162_v48 = vsub.f32 1.5, %v161_v44  ;;  %v181_v55 = vmul.f32 0.5, %v180_v47 }
  0x4f   :  { %v153_v50 = vmul.f32 %v272_v32, %v152_v45  ;;  %v172_v54 = vsub.f32 1.5, %v171_v46 }
  0x50   :  { %v163_v56 = vmul.f32 %v274_v33, %v162_v48  ;;  %v182_v58 = vsub.f32 1.5, %v181_v55 }
  0x51   :  { %v173_v57 = vmul.f32 %v276_v35, %v172_v54  ;;  %v157_v59 = vsel %vm386_vm10, %v272_v32, %v153_v50 }
  0x52   :  { %v167_v60 = vsel %vm382_vm6, %v274_v33, %v163_v56  ;;  %v183_v61 = vmul.f32 %v278_v37, %v182_v58 }
  0x53   :  { %v192_v62 = vrot.slane %v167_v60, 4  ;;  %v177_v63 = vsel %vm176_vm13, %v276_v35, %v173_v57 }
  0x54   :  { %v187_v0 = vsel %vm186_vm12, %v278_v37, %v183_v61 }
  0x55   :  { %v194_v1 = vsel %vm45_vm0, %v157_v59, %v192_v62  ;;  %v193_v2 = vrot.slane %v187_v0, 4 }
  0x56   :  { %v198_v3 = vmul.f32 %v194_v1, %v370_v52 }
  0x57   :  { %v195_v4 = vsel %vm45_vm0, %v177_v63, %v193_v2 }
  0x58   :  { %207 = vst [vmem:[#allocation1] ss:$2 sm:$0xff] %v198_v3  ;;  %v199_v5 = vmul.f32 %v195_v4, %v372_v53 }
  0x5a   :  { %211 = vst [vmem:[#allocation1 + $0x10] ss:$2 sm:$0xff] %v199_v5 }
  0x5f   :  { %v209_v7 = vld.sshfl [vmem:[#allocation1 + $0x8] sm:$0xff pattern:$0x75316420]  ;;  %v208_v9 = vld.sshfl [vmem:[#allocation1] sm:$0xff pattern:$0x75316420] }
  0x61   :  { %v213_v8 = vld.sshfl [vmem:[#allocation1 + $0x18] sm:$0xff pattern:$0x75316420]  ;;  %v212_v10 = vld.sshfl [vmem:[#allocation1 + $0x10] sm:$0xff pattern:$0x75316420] }
  0x7a   :  { %v203_v6 = vpop.permute.xlu0 %202 }
  0x7b   :  { %v219_v11 = vmul.f32 %v209_v7, %v203_v6  ;;  %v221_v12 = vmul.f32 %v213_v8, %v203_v6  ;;  %v218_v14 = vmul.f32 %v208_v9, %v203_v6  ;;  %v220_v15 = vmul.f32 %v212_v10, %v203_v6 }
  0x82   :  { %v225_v13 = vpop.permute.xlu0 %224 }
  0x83   :  { %v228_v16 = vadd.f32 %v225_v13, %v219_v11  ;;  %v230_v17 = vadd.f32 %v225_v13, %v221_v12  ;;  %v227_v52 = vadd.f32 %v225_v13, %v218_v14  ;;  %v229_v53 = vadd.f32 %v225_v13, %v220_v15 }
  0x85   :  { %v235_v18 = vrot.slane %v228_v16, 4  ;;  %v236_v19 = vrot.slane %v230_v17, 4 }
  0x87   :  { %v237_v20 = vsel %vm45_vm0, %v227_v52, %v235_v18  ;;  %v238_v21 = vsel %vm45_vm0, %v229_v53, %v236_v19 }
  0x88   :  { %241 = vst [vmem:[#allocation5] sm:$0xff] %v237_v20 }
  0x89   :  { %242 = vst [vmem:[#allocation5 + $0x8] sm:$0xff] %v238_v21 }
  0x8a   :  { %255 = dma.vmem_to_hbm [thread:$0]  %s248_s19, 256, %s250_s22, [#allocation4], %s332_s14, %s332_s14, %s333_s15  }
  0x8b   :  { %329 = dma.done.wait [#allocation4], 256  }
  0x8c   :  { %330 = vsyncadd [#allocation4], 4294967040 }
  0x8d   :  { %260 = vsyncpa [#allocation3], 1 }
  0x8e   :  { %261 = vsyncpa [#allocation4], 1 }

</bundles_post_ra>
